<compile_context>
chip_gen: v7x
topology: tpu7x:2x2x1
jax: 0.10.0
libtpu: 0.0.40
codegen_flags: <defaults>
</compile_context>

<pallas_src>
import jax
import jax.numpy as jnp
from jax.experimental import pallas as pl
from jax.experimental.pallas import tpu as pltpu

# ------------------- small ChatGLM2-like MLP config -------------------
HIDDEN       = 128     # config.hidden_size
FFN_HIDDEN   = 256     # config.ffn_hidden_size
SEQ          = 8
BATCH        = 2
MAX_ROW_TILE = 256     # clamp for large M; MXU-friendly multiple of 8


# ================================ kernel ================================

def _mlp_kernel(x_ref, w1_ref, w2_ref, o_ref):
    """Fused MLP: out = swiglu(x @ W1) @ W2 (bf16 MXU operands, f32 accumulate)."""
    x  = x_ref[...]                                   # (TM, H)   bf16
    w1 = w1_ref[...]                                  # (H, 2F)   bf16
    w2 = w2_ref[...]                                  # (F, H)    bf16

    # dense_h_to_4h on the MXU, f32 accumulation.
    h = jnp.dot(x, w1, preferred_element_type=jnp.float32)       # (TM, 2F) f32

    # SwiGLU: silu(h[..., :F]) * h[..., F:]
    # fp32 elementwise on the VPU (v5e has no bf16 VALU); sigmoid -> EUP slot.
    f = w2_ref.shape[0]
    a = h[:, :f]                                      # gate  (lane-aligned slice)
    b = h[:, f:]                                      # up
    act = a * jax.nn.sigmoid(a) * b                   # (TM, F) f32

    # dense_4h_to_h on the MXU.
    y = jnp.dot(act.astype(jnp.bfloat16), w2,
                preferred_element_type=jnp.float32)   # (TM, H) f32
    o_ref[...] = y.astype(o_ref.dtype)


# ============================ kernel wrapper ============================

def _pick_row_tile(m):
    """Whole-M block when it fits; otherwise largest multiple-of-8 divisor <= MAX_ROW_TILE."""
    if m <= MAX_ROW_TILE:
        return m
    for t in range(MAX_ROW_TILE, 7, -8):
        if m % t == 0:
            return t
    return m  # fallback: full-extent block (still legal per the (8,128) rule)


def mlp_forward(hidden_states, w1, w2):
    """hidden_states: (S, B, H) in ChatGLM2's [s, b, h] layout. Returns (S, B, H)."""
    S, B, H = hidden_states.shape
    two_f = w1.shape[1]
    F = w2.shape[0]
    M = S * B

    # Storage-dtype change (not wrapper pre-scaling): bf16 operands for the MXU,
    # done once outside the kernel so nothing is re-cast per grid step.
    x2d   = hidden_states.reshape(M, H).astype(jnp.bfloat16)
    w1_bf = w1.astype(jnp.bfloat16)
    w2_bf = w2.astype(jnp.bfloat16)

    tm = _pick_row_tile(M)
    grid = (M // tm,)   # == (1,) at these toy dims -> single kernel step

    flops = 2 * M * H * two_f + 2 * M * F * H
    transcendentals = M * F                                # sigmoid per gate element
    bytes_accessed = (x2d.size * 2 + w1_bf.size * 2 + w2_bf.size * 2
                      + M * H * jnp.dtype(hidden_states.dtype).itemsize)

    out = pl.pallas_call(
        _mlp_kernel,
        grid=grid,
        in_specs=[
            pl.BlockSpec((tm, H), lambda i: (i, 0)),          # x rows
            pl.BlockSpec((H, two_f), lambda i: (0, 0)),       # W1 (whole, grid-invariant)
            pl.BlockSpec((F, H), lambda i: (0, 0)),           # W2 (whole, grid-invariant)
        ],
        out_specs=pl.BlockSpec((tm, H), lambda i: (i, 0)),
        out_shape=jax.ShapeDtypeStruct((M, H), hidden_states.dtype),
        compiler_params=pltpu.CompilerParams(
            dimension_semantics=("parallel",)),
        cost_estimate=pl.CostEstimate(
            flops=flops,
            transcendentals=transcendentals,
            bytes_accessed=bytes_accessed),
    )(x2d, w1_bf, w2_bf)
    return out.reshape(S, B, H)


# ============================ references ============================

def mlp_reference_bf16(hidden_states, w1, w2):
    """Mirrors the kernel's bf16-MXU / f32-accumulate math (tight tolerance)."""
    S, B, H = hidden_states.shape
    F = w2.shape[0]
    x = hidden_states.reshape(S * B, H).astype(jnp.bfloat16)
    h = jnp.dot(x, w1.astype(jnp.bfloat16), preferred_element_type=jnp.float32)
    a, b = h[:, :F], h[:, F:]
    act = a * jax.nn.sigmoid(a) * b
    y = jnp.dot(act.astype(jnp.bfloat16), w2.astype(jnp.bfloat16),
                preferred_element_type=jnp.float32)
    return y.astype(hidden_states.dtype).reshape(S, B, H)


def mlp_reference_fp32(hidden_states, w1, w2):
    """Pure-fp32 ChatGLM2 MLP (fidelity check, looser tolerance)."""
    S, B, H = hidden_states.shape
    F = w2.shape[0]
    x = hidden_states.reshape(S * B, H)
    h = jnp.dot(x, w1, preferred_element_type=jnp.float32)
    a, b = h[:, :F], h[:, F:]
    act = a * jax.nn.sigmoid(a) * b
    y = jnp.dot(act, w2, preferred_element_type=jnp.float32)
    return y.astype(hidden_states.dtype).reshape(S, B, H)


# ================================== main ==================================

if __name__ == "__main__":
    key = jax.random.PRNGKey(0)
    kx, k1, k2 = jax.random.split(key, 3)

    hidden_states = jax.random.normal(kx, (SEQ, BATCH, HIDDEN), dtype=jnp.float32)
    w1 = 0.02 * jax.random.normal(k1, (HIDDEN, 2 * FFN_HIDDEN), dtype=jnp.float32)
    w2 = 0.02 * jax.random.normal(k2, (FFN_HIDDEN, HIDDEN), dtype=jnp.float32)

    out = mlp_forward(hidden_states, w1, w2)
    out = jax.block_until_ready(out)
    assert out.shape == (SEQ, BATCH, HIDDEN)

    # Tight check vs. a reference that uses the same bf16 MXU math.
    ref_bf16 = mlp_reference_bf16(hidden_states, w1, w2)
    assert jnp.allclose(out, ref_bf16, atol=2e-3, rtol=2e-3), "Pallas/bf16-ref mismatch"

    # Looser fidelity check vs. the original fp32 MLP semantics.
    ref_f32 = mlp_reference_fp32(hidden_states, w1, w2)
    assert jnp.allclose(out, ref_f32, atol=5e-3, rtol=5e-2), "Pallas/fp32-ref mismatch"

    print("KERNEL_OK")
</pallas_src>

<mosaic_0001>
module attributes {stable_mosaic.version = 11 : i64} {
  func.func @_mlp_kernel(%arg0: i32, %arg1: memref<16x128xbf16, #tpu.memory_space<vmem>>, %arg2: memref<128x512xbf16, #tpu.memory_space<vmem>>, %arg3: memref<256x128xbf16, #tpu.memory_space<vmem>>, %arg4: memref<16x128xf32, #tpu.memory_space<vmem>>) attributes {dimension_semantics = [#tpu.dimension_semantics<parallel>], iteration_bounds = array<i64: 1>, scalar_prefetch = 0 : i64, scratch_operands = 0 : i64, tpu.core_type = #tpu.core_type<tc>, window_params = [{transform_indices = @transform_0, window_bounds = array<i64: 16, 128>}, {pipeline_mode = #tpu.pipeline_mode<synchronous>, transform_indices = @transform_1, window_bounds = array<i64: 128, 512>}, {pipeline_mode = #tpu.pipeline_mode<synchronous>, transform_indices = @transform_2, window_bounds = array<i64: 256, 128>}, {transform_indices = @transform_3, window_bounds = array<i64: 16, 128>}]} {
    %c0 = arith.constant 0 : index
    %c0_0 = arith.constant 0 : index
    %0 = vector.load %arg1[%c0, %c0_0] : memref<16x128xbf16, #tpu.memory_space<vmem>>, vector<16x128xbf16>
    %c0_1 = arith.constant 0 : index
    %c0_2 = arith.constant 0 : index
    %1 = vector.load %arg2[%c0_1, %c0_2] : memref<128x512xbf16, #tpu.memory_space<vmem>>, vector<128x512xbf16>
    %c0_3 = arith.constant 0 : index
    %c0_4 = arith.constant 0 : index
    %2 = vector.load %arg3[%c0_3, %c0_4] : memref<256x128xbf16, #tpu.memory_space<vmem>>, vector<256x128xbf16>
    %cst = arith.constant dense<0.000000e+00> : vector<16x512xf32>
    %3 = tpu.matmul %0, %1, %cst {dimension_numbers = #tpu.dot_dimension_numbers<[1], [0], [0], [1], [0, 0, 1, 1], [], []>} : vector<16x128xbf16>, vector<128x512xbf16>, vector<16x512xf32> -> vector<16x512xf32>
    %4 = vector.extract_strided_slice %3 {offsets = [0, 0], sizes = [16, 256], strides = [1, 1]} : vector<16x512xf32> to vector<16x256xf32>
    %5 = vector.extract_strided_slice %3 {offsets = [0, 256], sizes = [16, 256], strides = [1, 1]} : vector<16x512xf32> to vector<16x256xf32>
    %6 = arith.negf %4 : vector<16x256xf32>
    %7 = math.exp %6 : vector<16x256xf32>
    %cst_5 = arith.constant 1.000000e+00 : f32
    %8 = vector.broadcast %cst_5 : f32 to vector<16x256xf32>
    %9 = arith.addf %8, %7 : vector<16x256xf32>
    %10 = arith.divf %8, %9 : vector<16x256xf32>
    %11 = arith.mulf %4, %10 : vector<16x256xf32>
    %12 = arith.mulf %11, %5 : vector<16x256xf32>
    %13 = arith.truncf %12 : vector<16x256xf32> to vector<16x256xbf16>
    %cst_6 = arith.constant dense<0.000000e+00> : vector<16x128xf32>
    %14 = tpu.matmul %13, %2, %cst_6 {dimension_numbers = #tpu.dot_dimension_numbers<[1], [0], [0], [1], [0, 0, 1, 1], [], []>} : vector<16x256xbf16>, vector<256x128xbf16>, vector<16x128xf32> -> vector<16x128xf32>
    %c0_7 = arith.constant 0 : index
    %c0_8 = arith.constant 0 : index
    %15 = vector.load %arg4[%c0_7, %c0_8] : memref<16x128xf32, #tpu.memory_space<vmem>>, vector<16x128xf32>
    tpu.vector_store %arg4[%c0_7, %c0_8], %14 {strides = array<i32>} : memref<16x128xf32, #tpu.memory_space<vmem>>, vector<16x128xf32>,
    return
  }
  func.func @transform_0(%arg0: i32) -> (i32, i32) {
    %c0_i32 = arith.constant 0 : i32
    %c0_i32_0 = arith.constant 0 : i32
    return %arg0, %c0_i32 : i32, i32
  }
  func.func @transform_1(%arg0: i32) -> (i32, i32) {
    %c0_i32 = arith.constant 0 : i32
    %c0_i32_0 = arith.constant 0 : i32
    %c0_i32_1 = arith.constant 0 : i32
    return %c0_i32, %c0_i32_0 : i32, i32
  }
  func.func @transform_2(%arg0: i32) -> (i32, i32) {
    %c0_i32 = arith.constant 0 : i32
    %c0_i32_0 = arith.constant 0 : i32
    %c0_i32_1 = arith.constant 0 : i32
    return %c0_i32, %c0_i32_0 : i32, i32
  }
  func.func @transform_3(%arg0: i32) -> (i32, i32) {
    %c0_i32 = arith.constant 0 : i32
    %c0_i32_0 = arith.constant 0 : i32
    return %arg0, %c0_i32 : i32, i32
  }
}

</mosaic_0001>

<bundles_post_ra>
// kernel: tpu_custom_call.1
= control target key start
LH: loop header
LB: loop body
LE: loop exit
PB: predicated region body
PF: predicated region fallthrough
CT: control target
= control target key end

     0   :  { %8 = vsyncpa [#allocation3], 0  ;;  %s906_s0 = inlined_call_operand.hbm [shape: bf16[16,128], index: 0, kind: input, shape index: {}]   ;;  %s907_s1 = inlined_call_operand.hbm [shape: bf16[128,512], index: 1, kind: input, shape index: {}]   ;;  %s908_s2 = inlined_call_operand.hbm [shape: bf16[256,128], index: 2, kind: input, shape index: {}]   ;;  %s909_s3 = inlined_call_operand.hbm [shape: f32[16,128], index: 3, kind: output, shape index: {}]  }
   0x1   :  { %9 = vsyncpa [#allocation6], 0 }
   0x2   :  { %10 = vsyncpa [#allocation4], 0  ;;  %s827_s12 = smov [#allocation5]   ;;  %s733_s16 = scalar_lea.hbm %s907_s1, 4096 }
   0x3   :  { %s28_s13 = sshll.u32 %s827_s12, 4  ;;  %p734_p0 = scmp.ne.s32.totalorder %s907_s1, %s733_s16  ;;  %s29_s13 = int_to_ptr.vmem [resolvable:$true] %s28_s13 }
   0x4   :  { %p737_p1 = scmp.lt.u32.totalorder %s733_s16, %s907_s1 }
   0x6   :  { %p739_p2 = pnand %p737_p1, %p734_p0 }
   0x8   :  { %742 = shalt.err (!%p739_p2)
}
   0x9   :  { %s743_s21 = scalar_lea.vmem %s29_s13, 4096  ;;  %p748_p4 = scmp.lt.s32.totalorder %s29_s13, %s29_s13 }
   0xa   :  { %p744_p3 = scmp.ne.s32.totalorder %s29_s13, %s743_s21  ;;  %p749_p5 = scmp.lt.s32.totalorder %s743_s21, %s743_s21 }
   0xc   :  { %p750_p6 = por %p749_p5, %p748_p4 }
   0xe   :  { %p751_p7 = pnand %p750_p6, %p744_p3 }
  0x10   :  { %754 = shalt.err (!%p751_p7)
}
  0x11   :  { %s828_s22 = smov 256   ;;  %s829_s23 = smov 16  }
  0x12   :  { %34 = dma.hbm_to_vmem [thread:$0]  %s907_s1, 4096, %s29_s13, [#allocation6], %s828_s22, %s828_s22, %s829_s23  }
  0x13   :  { %s830_s26 = smov [#allocation2]   ;;  %s755_s30 = scalar_lea.hbm %s906_s0, 128 }
  0x14   :  { %s16_s27 = sshll.u32 %s830_s26, 4  ;;  %p756_p8 = scmp.ne.s32.totalorder %s906_s0, %s755_s30  ;;  %s17_s27 = int_to_ptr.vmem [resolvable:$true] %s16_s27 }
  0x15   :  { %p759_p9 = scmp.lt.u32.totalorder %s755_s30, %s906_s0 }
  0x17   :  { %p761_p10 = pnand %p759_p9, %p756_p8 }
  0x19   :  { %764 = shalt.err (!%p761_p10)
}
  0x1a   :  { %s765_s8 = scalar_lea.vmem %s17_s27, 128  ;;  %p770_p12 = scmp.lt.s32.totalorder %s17_s27, %s17_s27 }
  0x1b   :  { %p766_p11 = scmp.ne.s32.totalorder %s17_s27, %s765_s8  ;;  %p771_p13 = scmp.lt.s32.totalorder %s765_s8, %s765_s8 }
  0x1d   :  { %p772_p0 = por %p771_p13, %p770_p12 }
  0x1f   :  { %p773_p1 = pnand %p772_p0, %p766_p11 }
  0x21   :  { %776 = shalt.err (!%p773_p1)
}
  0x22   :  { %s831_s1 = smov 64   ;;  %s832_s9 = smov 4  }
  0x23   :  { %22 = dma.hbm_to_vmem [thread:$0]  %s906_s0, 128, %s17_s27, [#allocation3], %s831_s1, %s831_s1, %s832_s9  }
  0x24   :  { %s833_s12 = smov [#allocation7]   ;;  %s777_s16 = scalar_lea.hbm %s908_s2, 2048 }
  0x25   :  { %s40_s13 = sshll.u32 %s833_s12, 4  ;;  %p778_p2 = scmp.ne.s32.totalorder %s908_s2, %s777_s16  ;;  %s41_s13 = int_to_ptr.vmem [resolvable:$true] %s40_s13 }
  0x26   :  { %p781_p3 = scmp.lt.u32.totalorder %s777_s16, %s908_s2 }
  0x28   :  { %p783_p4 = pnand %p781_p3, %p778_p2 }
  0x2a   :  { %786 = shalt.err (!%p783_p4)
}
  0x2b   :  { %s787_s21 = scalar_lea.vmem %s41_s13, 2048  ;;  %p792_p6 = scmp.lt.s32.totalorder %s41_s13, %s41_s13 }
  0x2c   :  { %p788_p5 = scmp.ne.s32.totalorder %s41_s13, %s787_s21  ;;  %p793_p7 = scmp.lt.s32.totalorder %s787_s21, %s787_s21 }
  0x2e   :  { %p794_p8 = por %p793_p7, %p792_p6 }
  0x30   :  { %p795_p9 = pnand %p794_p8, %p788_p5 }
  0x32   :  { %798 = shalt.err (!%p795_p9)
}
  0x33   :  { %46 = dma.hbm_to_vmem [thread:$0]  %s908_s2, 2048, %s41_s13, [#allocation6], %s831_s1, %s831_s1, %s832_s9  }
  0x34   :  { %821 = dma.done.wait [#allocation3], 128  }
  0x35   :  { %822 = vsyncadd [#allocation3], 4294967168 }
  0x36   :  { %823 = dma.done.wait [#allocation6], 6144  }
  0x37   :  { %824 = vsyncadd [#allocation6], 4294961152  ;;  %v834_v0 = vmov 0   ;;  %v652_v1 = vld [vmem:[#allocation5 + $0x4] ss:$16 sps:$4 sm:$0xff]   ;;  %v682_v29 = vld [vmem:[#allocation2] sm:$0xff]  }
  0x38   :  { %321 = vmatprep.mubr.bf16.mxu0 %v834_v0  ;;  %364 = vmatprep.mubr.bf16.mxu1 %v834_v0  ;;  %v654_v2 = vld [vmem:[#allocation5] ss:$16 sps:$4 sm:$0xff]   ;;  %v655_v3 = vld [vmem:[#allocation5 + $0x24] ss:$16 sps:$4 sm:$0xff]   ;;  %v673_v8 = vld [vmem:[#allocation5 + $0xc] ss:$16 sps:$4 sm:$0xff]  }
  0x39   :  { %289 = vmatprep.subr.bf16.mxu0 %v652_v1  ;;  %v657_v4 = vld [vmem:[#allocation5 + $0x20] ss:$16 sps:$4 sm:$0xff]   ;;  %v658_v5 = vld [vmem:[#allocation5 + $0x44] ss:$16 sps:$4 sm:$0xff]   ;;  %v675_v9 = vld [vmem:[#allocation5 + $0x8] ss:$16 sps:$4 sm:$0xff]   ;;  %332 = vmatprep.subr.bf16.mxu1 %v673_v8 }
  0x3a   :  { %290 = vmatpush1.bf16.msra.mxu0 %v654_v2  ;;  %v660_v6 = vld [vmem:[#allocation5 + $0x40] ss:$16 sps:$4 sm:$0xff]   ;;  %v661_v7 = vld [vmem:[#allocation5 + $0x64] ss:$16 sps:$4 sm:$0xff]   ;;  %v679_v12 = vld [vmem:[#allocation5 + $0x2c] ss:$16 sps:$4 sm:$0xff]   ;;  %333 = vmatpush1.bf16.msra.mxu1 %v675_v9 }
  0x3b   :  { %291 = vmatprep.subr.bf16.mxu0 %v655_v3  ;;  %v663_v10 = vld [vmem:[#allocation5 + $0x60] ss:$16 sps:$4 sm:$0xff]   ;;  %v664_v11 = vld [vmem:[#allocation5 + $0x84] ss:$16 sps:$4 sm:$0xff]   ;;  %v681_v13 = vld [vmem:[#allocation5 + $0x28] ss:$16 sps:$4 sm:$0xff]   ;;  %334 = vmatprep.subr.bf16.mxu1 %v679_v12 }
  0x3c   :  { %v666_v14 = vld [vmem:[#allocation5 + $0x80] ss:$16 sps:$4 sm:$0xff]   ;;  %v683_v15 = vld [vmem:[#allocation5 + $0x4c] ss:$16 sps:$4 sm:$0xff]   ;;  %v667_v16 = vld [vmem:[#allocation5 + $0xa4] ss:$16 sps:$4 sm:$0xff]  }
  0x3d   :  { %v685_v17 = vld [vmem:[#allocation5 + $0x48] ss:$16 sps:$4 sm:$0xff]   ;;  %v686_v18 = vld [vmem:[#allocation5 + $0x6c] ss:$16 sps:$4 sm:$0xff]   ;;  %v669_v19 = vld [vmem:[#allocation5 + $0xa0] ss:$16 sps:$4 sm:$0xff]  }
  0x3e   :  { %292 = vmatpush1.bf16.msra.mxu0 %v657_v4  ;;  %335 = vmatpush1.bf16.msra.mxu1 %v681_v13  ;;  %v670_v20 = vld [vmem:[#allocation5 + $0xc4] ss:$16 sps:$4 sm:$0xff]   ;;  %v672_v21 = vld [vmem:[#allocation5 + $0xc0] ss:$16 sps:$4 sm:$0xff]   ;;  %v688_v22 = vld [vmem:[#allocation5 + $0x68] ss:$16 sps:$4 sm:$0xff]  }
  0x3f   :  { %293 = vmatprep.subr.bf16.mxu0 %v658_v5  ;;  %336 = vmatprep.subr.bf16.mxu1 %v683_v15  ;;  %v676_v23 = vld [vmem:[#allocation5 + $0xe4] ss:$16 sps:$4 sm:$0xff]   ;;  %v689_v24 = vld [vmem:[#allocation5 + $0x8c] ss:$16 sps:$4 sm:$0xff]   ;;  %v691_v25 = vld [vmem:[#allocation5 + $0x88] ss:$16 sps:$4 sm:$0xff]  }
  0x40   :  { %v692_v26 = vld [vmem:[#allocation5 + $0xac] ss:$16 sps:$4 sm:$0xff]   ;;  %v678_v27 = vld [vmem:[#allocation5 + $0xe0] ss:$16 sps:$4 sm:$0xff]   ;;  %v694_v28 = vld [vmem:[#allocation5 + $0xa8] ss:$16 sps:$4 sm:$0xff]  }
  0x41   :  { %v695_v30 = vld [vmem:[#allocation5 + $0xcc] ss:$16 sps:$4 sm:$0xff]   ;;  %v697_v31 = vld [vmem:[#allocation5 + $0xc8] ss:$16 sps:$4 sm:$0xff]   ;;  %v701_v34 = vld [vmem:[#allocation7 + $0x40] sm:$0xff]   ;;  %s835_s2 = smov [#allocation8]  }
  0x42   :  { %294 = vmatpush1.bf16.msra.mxu0 %v660_v6  ;;  %337 = vmatpush1.bf16.msra.mxu1 %v685_v17  ;;  %v698_v32 = vld [vmem:[#allocation5 + $0xec] ss:$16 sps:$4 sm:$0xff]   ;;  %v700_v33 = vld [vmem:[#allocation5 + $0xe8] ss:$16 sps:$4 sm:$0xff]   ;;  %v702_v35 = vld [vmem:[#allocation7] sm:$0xff]   ;;  %s553_s23 = sshll.u32 %s835_s2, 4  ;;  %s554_s23 = int_to_ptr.vmem [resolvable:$true] %s553_s23 }
  0x43   :  { %295 = vmatprep.subr.bf16.mxu0 %v661_v7  ;;  %338 = vmatprep.subr.bf16.mxu1 %v686_v18  ;;  %v703_v36 = vld [vmem:[#allocation7 + $0x48] sm:$0xff]   ;;  %v705_v38 = vld [vmem:[#allocation7 + $0x50] sm:$0xff]   ;;  %v707_v40 = vld [vmem:[#allocation7 + $0x58] sm:$0xff]   ;;  %s799_s24 = scalar_lea.vmem %s554_s23, 256  ;;  %p804_p11 = scmp.lt.s32.totalorder %s554_s23, %s554_s23 }
  0x44   :  { %v704_v37 = vld [vmem:[#allocation7 + $0x8] sm:$0xff]   ;;  %v706_v39 = vld [vmem:[#allocation7 + $0x10] sm:$0xff]   ;;  %v708_v41 = vld [vmem:[#allocation7 + $0x18] sm:$0xff]   ;;  %p800_p10 = scmp.ne.s32.totalorder %s554_s23, %s799_s24  ;;  %p805_p12 = scmp.lt.s32.totalorder %s799_s24, %s799_s24 }
  0x45   :  { %v709_v42 = vld [vmem:[#allocation7 + $0x60] sm:$0xff]   ;;  %v711_v44 = vld [vmem:[#allocation7 + $0x68] sm:$0xff]   ;;  %v713_v46 = vld [vmem:[#allocation7 + $0x70] sm:$0xff]  }
  0x46   :  { %296 = vmatpush1.bf16.msra.mxu0 %v663_v10  ;;  %339 = vmatpush1.bf16.msra.mxu1 %v688_v22  ;;  %v710_v43 = vld [vmem:[#allocation7 + $0x20] sm:$0xff]   ;;  %v712_v45 = vld [vmem:[#allocation7 + $0x28] sm:$0xff]   ;;  %v714_v47 = vld [vmem:[#allocation7 + $0x30] sm:$0xff]   ;;  %p806_p13 = por %p805_p12, %p804_p11 }
  0x47   :  { %297 = vmatprep.subr.bf16.mxu0 %v664_v11  ;;  %340 = vmatprep.subr.bf16.mxu1 %v689_v24  ;;  %v715_v48 = vld [vmem:[#allocation7 + $0x78] sm:$0xff]  }
  0x48   :  { %v716_v49 = vld [vmem:[#allocation7 + $0x38] sm:$0xff]   ;;  %p807_p0 = pnand %p806_p13, %p800_p10 }
  0x4a   :  { %298 = vmatpush1.bf16.msra.mxu0 %v666_v14  ;;  %341 = vmatpush1.bf16.msra.mxu1 %v691_v25 }
  0x4b   :  { %299 = vmatprep.subr.bf16.mxu0 %v667_v16  ;;  %342 = vmatprep.subr.bf16.mxu1 %v692_v26 }
  0x4e   :  { %300 = vmatpush1.bf16.msra.mxu0 %v669_v19  ;;  %343 = vmatpush1.bf16.msra.mxu1 %v694_v28 }
  0x4f   :  { %301 = vmatprep.subr.bf16.mxu0 %v670_v20  ;;  %344 = vmatprep.subr.bf16.mxu1 %v695_v30 }
  0x52   :  { %302 = vmatpush1.bf16.msra.mxu0 %v672_v21  ;;  %345 = vmatpush1.bf16.msra.mxu1 %v697_v31 }
  0x53   :  { %303 = vmatprep.subr.bf16.mxu0 %v676_v23  ;;  %346 = vmatprep.subr.bf16.mxu1 %v698_v32 }
  0x56   :  { %304 = vmatpush1.bf16.msra.mxu0 %v678_v27  ;;  %347 = vmatpush1.bf16.msra.mxu1 %v700_v33 }
  0x57   :  { %619 = vmatprep.subr.bf16.mxu0 %v701_v34 }
  0x59   :  { %322 = vmatmul.mubr.bf16.vlgmr.msra.gmra.mrb[0].mxu0 %v682_v29  ;;  %365 = vmatmul.mubr.bf16.vlgmr.msra.gmra.mrb[0].mxu1 %v682_v29 }
  0x5a   :  { %620 = vmatpush3.bf16.msra.mxu0 %v702_v35 }
  0x5b   :  { %621 = vmatprep.subr.bf16.mxu0 %v703_v36 }
  0x5e   :  { %622 = vmatpush3.bf16.msra.mxu0 %v704_v37 }
  0x5f   :  { %623 = vmatprep.subr.bf16.mxu0 %v705_v38 }
  0x62   :  { %624 = vmatpush3.bf16.msra.mxu0 %v706_v39 }
  0x63   :  { %625 = vmatprep.subr.bf16.mxu0 %v707_v40 }
  0x66   :  { %626 = vmatpush3.bf16.msra.mxu0 %v708_v41 }
  0x67   :  { %627 = vmatprep.subr.bf16.mxu0 %v709_v42 }
  0x6a   :  { %628 = vmatpush3.bf16.msra.mxu0 %v710_v43 }
  0x6b   :  { %629 = vmatprep.subr.bf16.mxu0 %v711_v44 }
  0x6e   :  { %630 = vmatpush3.bf16.msra.mxu0 %v712_v45 }
  0x6f   :  { %631 = vmatprep.subr.bf16.mxu0 %v713_v46 }
  0x72   :  { %632 = vmatpush3.bf16.msra.mxu0 %v714_v47 }
  0x73   :  { %633 = vmatprep.subr.bf16.mxu0 %v715_v48 }
  0x76   :  { %634 = vmatpush3.bf16.msra.mxu0 %v716_v49 }
 0x12c   :  { %v323_v50 = vpop.f32.mrb[0].mxu0  ;;  %v366_v58 = vpop.f32.mrb[0].mxu1 }
 0x12d   :  { %v599_v51 = vmul.f32 -1.442695, %v323_v50  ;;  %v325_v52 = vpop.f32.mrb[1].mxu0  ;;  %v368_v59 = vpop.f32.mrb[1].mxu1 }
 0x12e   :  { %v600_v53 = vmul.f32 -1.442695, %v325_v52  ;;  %v327_v54 = vpop.f32.mrb[2].mxu0  ;;  %v370_v60 = vpop.f32.mrb[2].mxu1 }
 0x12f   :  { %717 = vpow2.f32 %v599_v51  ;;  %v601_v55 = vmul.f32 -1.442695, %v327_v54  ;;  %v329_v56 = vpop.f32.mrb[3].mxu0  ;;  %v372_v62 = vpop.f32.mrb[3].mxu1 }
 0x130   :  { %719 = vpow2.f32 %v600_v53  ;;  %v602_v57 = vmul.f32 -1.442695, %v329_v56 }
 0x131   :  { %721 = vpow2.f32 %v601_v55 }
 0x132   :  { %723 = vpow2.f32 %v602_v57 }
 0x139   :  { %v718_v61 = vpop.eup %717 }
 0x13a   :  { %v720_v63 = vpop.eup %719  ;;  %v387_v0 = vadd.f32 1.0, %v718_v61 }
 0x13b   :  { %v722_v1 = vpop.eup %721  ;;  %v388_v2 = vadd.f32 1.0, %v720_v63 }
 0x13c   :  { %v724_v3 = vpop.eup %723  ;;  %725 = vrcp.f32 %v387_v0  ;;  %v389_v4 = vadd.f32 1.0, %v722_v1 }
 0x13d   :  { %727 = vrcp.f32 %v388_v2  ;;  %v390_v5 = vadd.f32 1.0, %v724_v3 }
 0x13e   :  { %729 = vrcp.f32 %v389_v4 }
 0x13f   :  { %731 = vrcp.f32 %v390_v5 }
 0x146   :  { %v726_v6 = vpop.eup %725 }
 0x147   :  { %v728_v7 = vpop.eup %727  ;;  %v399_v8 = vmul.f32 %v726_v6, %v323_v50 }
 0x148   :  { %v730_v9 = vpop.eup %729  ;;  %v400_v10 = vmul.f32 %v728_v7, %v325_v52 }
 0x149   :  { %v732_v11 = vpop.eup %731  ;;  %v401_v12 = vmul.f32 %v730_v9, %v327_v54  ;;  %v403_v13 = vmul.f32 %v399_v8, %v366_v58 }
 0x14a   :  { %v402_v14 = vmul.f32 %v732_v11, %v329_v56  ;;  %v404_v15 = vmul.f32 %v400_v10, %v368_v59 }
 0x14b   :  { %v405_v16 = vmul.f32 %v401_v12, %v370_v60 }
 0x14c   :  { %v406_v17 = vmul.f32 %v402_v14, %v372_v62 }
 0x14d   :  { %v407_v18 = vpack.c.bf16 %v405_v16, %v403_v13 }
 0x14e   :  { %v408_v19 = vpack.c.bf16 %v406_v17, %v404_v15 }
 0x150   :  { %537 = vmatprep.mubr.bf16.mxu0 %v408_v19 }
 0x151   :  { %538 = vmatmul.mubr.bf16.vlgmr.msra.gmra.mrb[4].mxu0 %v407_v18 }
 0x224   :  { %v635_v20 = vpop.f32.mrb[4].mxu0 }
 0x225   :  { %v636_v21 = vpop.f32.mrb[5].mxu0 }
 0x226   :  { %v637_v22 = vadd.f32 %v636_v21, %v635_v20  ;;  %v638_v23 = vpop.f32.mrb[6].mxu0 }
 0x227   :  { %v639_v24 = vpop.f32.mrb[7].mxu0 }
 0x228   :  { %546 = vst [vmem:[#allocation8] sm:$0xff] %v637_v22  ;;  %v640_v25 = vadd.f32 %v639_v24, %v638_v23 }
 0x22a   :  { %547 = vst [vmem:[#allocation8 + $0x8] sm:$0xff] %v640_v25 }
 0x22b   :  { %810 = shalt.err (!%p807_p0)
}
 0x22c   :  { %s811_s27 = scalar_lea.hbm %s909_s3, 256 }
 0x22d   :  { %p812_p1 = scmp.ne.s32.totalorder %s909_s3, %s811_s27  ;;  %p815_p2 = scmp.lt.u32.totalorder %s811_s27, %s909_s3 }
 0x22f   :  { %p817_p3 = pnand %p815_p2, %p812_p1 }
 0x231   :  { %820 = shalt.err (!%p817_p3)
}
 0x232   :  { %s836_s5 = smov 128   ;;  %s837_s6 = smov 8  }
 0x233   :  { %559 = dma.vmem_to_hbm [thread:$0]  %s554_s23, 256, %s909_s3, [#allocation4], %s836_s5, %s836_s5, %s837_s6  }
 0x234   :  { %825 = dma.done.wait [#allocation4], 256  }
 0x235   :  { %826 = vsyncadd [#allocation4], 4294967040 }
 0x236   :  { %563 = vsyncpa [#allocation3], 1 }
 0x237   :  { %564 = vsyncpa [#allocation6], 1 }
 0x238   :  { %565 = vsyncpa [#allocation4], 1 }

</bundles_post_ra>
